<compile_context>
chip_gen: v6e
topology: v6e:2x2x1
jax: 0.10.0
libtpu: 0.0.40
codegen_flags: <defaults>
</compile_context>

<pallas_src>
import functools

import jax
import jax.numpy as jnp
from jax import lax
from jax.experimental import pallas as pl
from jax.experimental.pallas import tpu as pltpu


# ----------------------------------------------------------------------------
# Helpers
# ----------------------------------------------------------------------------
def _round_up(x, m):
    return (x + m - 1) // m * m


def _pad_n(n):
    # Pad output-feature dims to "nice" multiples so big slabs get big tiles.
    if n >= 4096:
        return _round_up(n, 1024)
    return _round_up(n, 128)


def _divisors_128(dim, cap=4096):
    base = dim // 128
    out = [128 * k for k in range(1, base + 1) if base % k == 0 and 128 * k <= cap]
    return sorted(out, reverse=True)


_VMEM_BLOCK_BUDGET = 10 * 1024 * 1024


def _pick_tiles(M, Kp, Np, out_bytes):
    """Choose (TM, TN, TK, Mp) minimizing grid steps under a VMEM block budget."""
    Mp = _round_up(M, 8)
    if Mp <= 1024:
        tm_cands = [Mp]
    else:
        Mp = _round_up(Mp, 512)
        tm_cands = ([1024] if Mp % 1024 == 0 else []) + [512]
    best = None
    for tm in tm_cands:
        for tn in _divisors_128(Np):
            for tk in _divisors_128(Kp):
                vmem = (2 * tm * tk * 2 + 2 * tk * tn * 2 + 2 * tn * 4
                        + 2 * tm * tn * out_bytes + tm * tn * 4)
                if vmem > _VMEM_BLOCK_BUDGET:
                    continue
                steps = (Mp // tm) * (Np // tn) * (Kp // tk)
                key = (steps, -vmem)
                if best is None or key < best[0]:
                    best = (key, tm, tn, tk, Mp)
    if best is None:
        return min(tm_cands), 128, 128, Mp
    return best[1], best[2], best[3], best[4]


# Pre-packed (transposed + padded, bf16) weight container.  Integer metadata
# lives in the pytree aux data so it stays static under jax.jit.
class Packed:
    def __init__(self, wp, bp, n, kh=1, kw=1):
        self.wp = wp          # (Kp, Np) bf16
        self.bp = bp          # (1, Np) f32
        self.n = n            # true output features
        self.kh = kh
        self.kw = kw


jax.tree_util.register_pytree_node(
    Packed,
    lambda p: ((p.wp, p.bp), (p.n, p.kh, p.kw)),
    lambda aux, ch: Packed(ch[0], ch[1], *aux),
)


# ----------------------------------------------------------------------------
# Pallas kernels
# ----------------------------------------------------------------------------
def _mm_kernel(a_ref, b_ref, bias_ref, o_ref, acc_ref):
    k = pl.program_id(2)

    @pl.when(k == 0)
    def _():
        acc_ref[...] = jnp.zeros_like(acc_ref)

    acc_ref[...] += jnp.dot(a_ref[...], b_ref[...],
                            preferred_element_type=jnp.float32)

    @pl.when(k == pl.num_programs(2) - 1)
    def _():
        o_ref[...] = (acc_ref[...] + bias_ref[...]).astype(o_ref.dtype)


def matmul_prepacked(a, p, out_dtype=jnp.bfloat16):
    """a: (M, K) -> (M, p.n) using pre-packed bf16 weight p (fp32 accumulate)."""
    M, K = a.shape
    Kp, Np = p.wp.shape
    TM, TN, TK, Mp = _pick_tiles(M, Kp, Np, jnp.dtype(out_dtype).itemsize)

    a_bf = a.astype(jnp.bfloat16)
    if (Mp, Kp) != (M, K):
        a_bf = jnp.pad(a_bf, ((0, Mp - M), (0, Kp - K)))

    out = pl.pallas_call(
        _mm_kernel,
        out_shape=jax.ShapeDtypeStruct((Mp, Np), out_dtype),
        grid_spec=pltpu.PrefetchScalarGridSpec(
            num_scalar_prefetch=0,
            grid=(Mp // TM, Np // TN, Kp // TK),
            in_specs=[
                pl.BlockSpec((TM, TK), lambda m, n, k: (m, k)),
                pl.BlockSpec((TK, TN), lambda m, n, k: (k, n)),
                pl.BlockSpec((1, TN), lambda m, n, k: (0, n)),
            ],
            out_specs=pl.BlockSpec((TM, TN), lambda m, n, k: (m, n)),
            scratch_shapes=[pltpu.VMEM((TM, TN), jnp.float32)],
        ),
        compiler_params=pltpu.CompilerParams(
            dimension_semantics=("parallel", "parallel", "arbitrary"),
            vmem_limit_bytes=32 * 1024 * 1024),
    )(a_bf, p.wp, p.bp)
    if (Mp, Np) != (M, p.n):
        out = out[:M, :p.n]
    return out


def _attn_single_kernel(q_ref, k_ref, v_ref, bias_ref, o_ref, *, scale):
    # Whole KV in one block, all heads batched -> plain softmax, no recurrence.
    s = jnp.einsum("bqd,bkd->bqk", q_ref[...], k_ref[...],
                   preferred_element_type=jnp.float32)
    s = s * scale + bias_ref[...]
    m = s.max(axis=-1, keepdims=True)
    p = jnp.exp(s - m)
    l = p.sum(axis=-1, keepdims=True)
    o = jnp.einsum("bqk,bkd->bqd", p.astype(v_ref.dtype), v_ref[...],
                   preferred_element_type=jnp.float32)
    o_ref[...] = (o * pl.reciprocal(l, approx=True)).astype(o_ref.dtype)


def _flash_kernel(q_ref, k_ref, v_ref, bias_ref, o_ref,
                  m_sc, l_sc, acc_sc, *, scale):
    ki = pl.program_id(2)

    @pl.when(ki == 0)
    def _():
        m_sc[...] = jnp.full_like(m_sc, -1e30)
        l_sc[...] = jnp.zeros_like(l_sc)
        acc_sc[...] = jnp.zeros_like(acc_sc)

    s = lax.dot_general(q_ref[0], k_ref[0], (((1,), (1,)), ((), ())),
                        preferred_element_type=jnp.float32)
    s = s * scale + bias_ref[...]
    m_new = jnp.maximum(m_sc[...], s.max(axis=-1, keepdims=True))
    alpha = jnp.exp(m_sc[...] - m_new)
    p = jnp.exp(s - m_new)
    l_sc[...] = alpha * l_sc[...] + p.sum(axis=-1, keepdims=True)
    acc_sc[...] = alpha * acc_sc[...] + jnp.dot(
        p.astype(v_ref.dtype), v_ref[0], preferred_element_type=jnp.float32)
    m_sc[...] = m_new

    @pl.when(ki == pl.num_programs(2) - 1)
    def _():
        o_ref[0] = (acc_sc[...] *
                    pl.reciprocal(l_sc[...], approx=True)).astype(o_ref.dtype)


def attention(q, k, v, scale):
    """q: (BH, Lq, dh), k/v: (BH, Lk, dh) -> (BH, Lq, dh) bf16."""
    BH, Lq, dh = q.shape
    Lk = k.shape[1]
    # TODO(synk): head dim is padded to a 128-lane multiple for fully aligned
    # MXU operands; an unpadded-dh variant would cut K/V DMA further.
    Dp = _round_up(dh, 128)
    q = q.astype(jnp.bfloat16)
    k = k.astype(jnp.bfloat16)
    v = v.astype(jnp.bfloat16)
    Lk8 = _round_up(Lk, 8)

    if Lk8 <= 128:
        # ---- single-block path (short KV: cross-attn, small spatial levels) ----
        TQ = min(128, _round_up(Lq, 8))
        Lqp = _round_up(Lq, TQ)
        qp = jnp.pad(q, ((0, 0), (0, Lqp - Lq), (0, Dp - dh)))
        kp = jnp.pad(k, ((0, 0), (0, Lk8 - Lk), (0, Dp - dh)))
        vp = jnp.pad(v, ((0, 0), (0, Lk8 - Lk), (0, Dp - dh)))
        bias = jnp.where(jnp.arange(Lk8) < Lk, 0.0, -1e30).astype(jnp.float32)
        bias = bias.reshape(1, Lk8)
        out = pl.pallas_call(
            functools.partial(_attn_single_kernel, scale=scale),
            out_shape=jax.ShapeDtypeStruct((BH, Lqp, Dp), jnp.bfloat16),
            grid_spec=pltpu.PrefetchScalarGridSpec(
                num_scalar_prefetch=0,
                grid=(Lqp // TQ,),
                in_specs=[
                    pl.BlockSpec((BH, TQ, Dp), lambda qi: (0, qi, 0)),
                    pl.BlockSpec((BH, Lk8, Dp), lambda qi: (0, 0, 0)),
                    pl.BlockSpec((BH, Lk8, Dp), lambda qi: (0, 0, 0)),
                    pl.BlockSpec((1, Lk8), lambda qi: (0, 0)),
                ],
                out_specs=pl.BlockSpec((BH, TQ, Dp), lambda qi: (0, qi, 0)),
            ),
            compiler_params=pltpu.CompilerParams(
                dimension_semantics=("parallel",)),
        )(qp, kp, vp, bias)
        return out[:, :Lq, :dh]

    # ---- general flash path (long KV: large spatial self-attention) ----
    TQ = min(128, _round_up(Lq, 8))
    Lqp = _round_up(Lq, TQ)
    TKV = 256                      # keep score tile vreg-friendly
    Lkp = _round_up(Lk, TKV)
    qp = jnp.pad(q, ((0, 0), (0, Lqp - Lq), (0, Dp - dh)))
    kp = jnp.pad(k, ((0, 0), (0, Lkp - Lk), (0, Dp - dh)))
    vp = jnp.pad(v, ((0, 0), (0, Lkp - Lk), (0, Dp - dh)))
    bias = jnp.where(jnp.arange(Lkp) < Lk, 0.0, -1e30).astype(jnp.float32)
    bias = bias.reshape(1, Lkp)
    out = pl.pallas_call(
        functools.partial(_flash_kernel, scale=scale),
        out_shape=jax.ShapeDtypeStruct((BH, Lqp, Dp), jnp.bfloat16),
        grid_spec=pltpu.PrefetchScalarGridSpec(
            num_scalar_prefetch=0,
            grid=(BH, Lqp // TQ, Lkp // TKV),
            in_specs=[
                pl.BlockSpec((1, TQ, Dp), lambda bh, qi, ki: (bh, qi, 0)),
                pl.BlockSpec((1, TKV, Dp), lambda bh, qi, ki: (bh, ki, 0)),
                pl.BlockSpec((1, TKV, Dp), lambda bh, qi, ki: (bh, ki, 0)),
                pl.BlockSpec((1, TKV), lambda bh, qi, ki: (0, ki)),
            ],
            out_specs=pl.BlockSpec((1, TQ, Dp), lambda bh, qi, ki: (bh, qi, 0)),
            scratch_shapes=[
                pltpu.VMEM((TQ, 1), jnp.float32),
                pltpu.VMEM((TQ, 1), jnp.float32),
                pltpu.VMEM((TQ, Dp), jnp.float32),
            ],
        ),
        compiler_params=pltpu.CompilerParams(
            dimension_semantics=("parallel", "parallel", "arbitrary")),
    )(qp, kp, vp, bias)
    return out[:, :Lq, :dh]


# ----------------------------------------------------------------------------
# Plain-JAX glue ops (fused around the kernels by block-level jit)
# TODO(synk): GroupNorm / LayerNorm / SiLU / GELU remain XLA-fused glue; the
#             matmuls / convs / attention are the Pallas hot path.
# ----------------------------------------------------------------------------
def silu(x):
    return x * jax.nn.sigmoid(x)


def group_norm(x, weight, bias, groups=32, eps=1e-5):
    # x: (B, H, W, C) NHWC.  Reduce (H, W) with C on the lane axis, then
    # combine per-group on a tiny (B, groups) array.
    b, h, w, c = x.shape
    g = c // groups
    xf = x.astype(jnp.float32)
    s1 = jnp.sum(xf, axis=(1, 2))                     # (B, C)
    s2 = jnp.sum(xf * xf, axis=(1, 2))                # (B, C)
    s1g = s1.reshape(b, groups, g).sum(-1)            # (B, groups)
    s2g = s2.reshape(b, groups, g).sum(-1)
    n = h * w * g
    mean = s1g / n
    var = jnp.maximum(s2g / n - mean * mean, 0.0)
    inv = lax.rsqrt(var + eps)
    mean = jnp.repeat(mean, g, axis=1).reshape(b, 1, 1, c)
    inv = jnp.repeat(inv, g, axis=1).reshape(b, 1, 1, c)
    return (xf - mean) * inv * weight + bias


def layer_norm(x, weight, bias, eps=1e-5):
    xf = x.astype(jnp.float32)
    mean = xf.mean(axis=-1, keepdims=True)
    var = ((xf - mean) ** 2).mean(axis=-1, keepdims=True)
    return (xf - mean) * lax.rsqrt(var + eps) * weight + bias


def upsample2x(x):
    # NHWC nearest-neighbour via one broadcast + reshape.
    b, h, w, c = x.shape
    x = jnp.broadcast_to(x[:, :, None, :, None, :], (b, h, 2, w, 2, c))
    return x.reshape(b, 2 * h, 2 * w, c)


# ----------------------------------------------------------------------------
# Layer wrappers on the Pallas matmul (NHWC everywhere)
# ----------------------------------------------------------------------------
def linear(x, p, out_dtype=jnp.bfloat16):
    shape = x.shape
    y = matmul_prepacked(x.reshape(-1, shape[-1]), p, out_dtype)
    return y.reshape(shape[:-1] + (p.n,))


def _conv2d(x, p, stride=1, padding=0):
    # x: (B, H, W, C) NHWC; p: Packed with weight rows ordered (di, dj, C).
    B, H, W, C = x.shape
    kh, kw = p.kh, p.kw
    x = x.astype(jnp.bfloat16)
    if padding:
        x = jnp.pad(x, ((0, 0), (padding, padding), (padding, padding), (0, 0)))
    Hp, Wp = x.shape[1], x.shape[2]
    Ho = (Hp - kh) // stride + 1
    Wo = (Wp - kw) // stride + 1
    if kh == 1 and kw == 1 and stride == 1:
        cols = x.reshape(B * Ho * Wo, C)
    else:
        # TODO(synk): im2col still materializes a kh*kw channel-concat slab in
        # HBM (bf16); an in-kernel shifted-window gather would remove it.
        parts = [x[:, di:di + stride * Ho:stride, dj:dj + stride * Wo:stride, :]
                 for di in range(kh) for dj in range(kw)]
        cols = jnp.concatenate(parts, axis=-1).reshape(B * Ho * Wo, kh * kw * C)
    y = matmul_prepacked(cols, p)
    return y.reshape(B, Ho, Wo, p.n)


conv2d = jax.jit(_conv2d, static_argnames=("stride", "padding"))


# ----------------------------------------------------------------------------
# Modules (NHWC)
# ----------------------------------------------------------------------------
def _resnet(p, x, t_proj):
    # t_proj: (1, dim_out) pre-computed SiLU+Linear time projection.
    res = x
    t = t_proj.reshape(1, 1, 1, -1)
    h = group_norm(x, p["norm0_w"], p["norm0_b"], eps=1e-5)
    h = silu(h)
    h = _conv2d(h, p["conv0"], stride=1, padding=1)
    h = h + t
    h = group_norm(h, p["norm1_w"], p["norm1_b"], eps=1e-5)
    h = silu(h)
    h = _conv2d(h, p["conv1"], stride=1, padding=1)
    if "res" in p:
        res = _conv2d(res, p["res"], stride=1, padding=0)
    return (res + h).astype(jnp.bfloat16)


def cross_attention(p, q, kv):
    if "qkv" in p:                                  # self-attention: fused QKV
        qkv = linear(q, p["qkv"])                   # (b, lq, 3*dim)
        dim = qkv.shape[-1] // 3
        qh, kh, vh = qkv[..., :dim], qkv[..., dim:2 * dim], qkv[..., 2 * dim:]
    else:                                           # cross-attention: fused KV
        qh = linear(q, p["q"])                      # (b, lq, dim)
        kvh = linear(kv, p["kv"])                   # (b, lk, 2*dim)
        dim = qh.shape[-1]
        kh, vh = kvh[..., :dim], kvh[..., dim:]
    b, lq, _ = qh.shape
    dh = dim // 8

    def split_heads(x):
        bb, l, d = x.shape
        return x.reshape(bb, l, 8, dh).transpose(0, 2, 1, 3).reshape(bb * 8, l, dh)

    out = attention(split_heads(qh), split_heads(kh), split_heads(vh),
                    scale=dh ** (-0.5))             # (b*8, lq, dh) bf16
    out = out.reshape(b, 8, lq, dh).transpose(0, 2, 1, 3).reshape(b, lq, dim)
    return linear(out, p["out"])


def _transformer(p, q, kv):
    b, h, w, dim = q.shape
    res1 = q
    x = group_norm(q, p["norm_in_w"], p["norm_in_b"], eps=1e-6)
    x = _conv2d(x, p["cnn_in"], stride=1, padding=0)
    x = x.reshape(b, h * w, dim)
    xn = layer_norm(x, p["ln0_w"], p["ln0_b"])
    x = cross_attention(p["atten1"], xn, xn) + x
    xn = layer_norm(x, p["ln1_w"], p["ln1_b"])
    x = cross_attention(p["atten2"], xn, kv) + x
    res2 = x
    xn = layer_norm(x, p["ln_act_w"], p["ln_act_b"])
    y = linear(xn, p["fc0"])
    d = y.shape[-1] // 2
    y = y[..., :d] * jax.nn.gelu(y[..., d:], approximate=False)
    x = linear(y, p["fc1"]) + res2
    x = x.reshape(b, h, w, dim)
    x = _conv2d(x, p["cnn_out"], stride=1, padding=0) + res1
    return x.astype(jnp.bfloat16)


resnet = jax.jit(_resnet)
transformer = jax.jit(_transformer)


@jax.jit
def time_embed(p0, p1, p_all, time):
    e = jnp.exp(jnp.arange(160, dtype=jnp.float32) * (-9.210340371976184 / 160.0)) * time
    t = jnp.concatenate([jnp.cos(e), jnp.sin(e)])[None, :]          # (1, 320)
    t = linear(t, p0, jnp.float32)
    t = silu(t)
    t = linear(t, p1, jnp.float32)                                   # (1, 1280)
    # All per-resnet (SiLU -> Linear(1280, dim_out)) projections in ONE matmul.
    return linear(silu(t), p_all, jnp.float32)                       # (1, total)


def down_block(p, x, enc, tps):
    outs = []
    x = resnet(p["res0"], x, tps[0])
    x = transformer(p["tf0"], x, enc)
    outs.append(x)
    x = resnet(p["res1"], x, tps[1])
    x = transformer(p["tf1"], x, enc)
    outs.append(x)
    x = conv2d(x, p["out"], stride=2, padding=1)
    outs.append(x)
    return x, outs


def up_block(p, x, enc, tps, out_down):
    x = resnet(p["res0"], jnp.concatenate([x, out_down.pop()], axis=-1), tps[0])
    x = transformer(p["tf0"], x, enc)
    x = resnet(p["res1"], jnp.concatenate([x, out_down.pop()], axis=-1), tps[1])
    x = transformer(p["tf1"], x, enc)
    x = resnet(p["res2"], jnp.concatenate([x, out_down.pop()], axis=-1), tps[2])
    x = transformer(p["tf2"], x, enc)
    if "out" in p:
        x = upsample2x(x)
        x = conv2d(x, p["out"], stride=1, padding=1)
    return x


def unet_forward(params, out_vae, out_encoder, time):
    tt = params["time_table"]
    x = out_vae.transpose(0, 2, 3, 1)                               # NCHW -> NHWC
    x = conv2d(x, params["in_vae"], stride=1, padding=1)
    t_all = time_embed(params["in_time0"], params["in_time1"],
                       params["time_all"], time)                    # (1, total)

    def TP(name):
        off, d = tt[name]
        return t_all[:, off:off + d]

    out_down = [x]
    x, outs = down_block(params["down_block0"], x, out_encoder,
                         (TP("db0.res0"), TP("db0.res1")))
    out_down.extend(outs)
    x, outs = down_block(params["down_block1"], x, out_encoder,
                         (TP("db1.res0"), TP("db1.res1")))
    out_down.extend(outs)
    x, outs = down_block(params["down_block2"], x, out_encoder,
                         (TP("db2.res0"), TP("db2.res1")))
    out_down.extend(outs)

    x = resnet(params["down_res0"], x, TP("down_res0"))
    out_down.append(x)
    x = resnet(params["down_res1"], x, TP("down_res1"))
    out_down.append(x)

    x = resnet(params["mid_res0"], x, TP("mid_res0"))
    x = transformer(params["mid_tf"], x, out_encoder)
    x = resnet(params["mid_res1"], x, TP("mid_res1"))

    x = resnet(params["up_res0"],
               jnp.concatenate([x, out_down.pop()], axis=-1), TP("up_res0"))
    x = resnet(params["up_res1"],
               jnp.concatenate([x, out_down.pop()], axis=-1), TP("up_res1"))
    x = resnet(params["up_res2"],
               jnp.concatenate([x, out_down.pop()], axis=-1), TP("up_res2"))

    x = upsample2x(x)
    x = conv2d(x, params["up_in"], stride=1, padding=1)

    x = up_block(params["up_block0"], x, out_encoder,
                 (TP("ub0.res0"), TP("ub0.res1"), TP("ub0.res2")), out_down)
    x = up_block(params["up_block1"], x, out_encoder,
                 (TP("ub1.res0"), TP("ub1.res1"), TP("ub1.res2")), out_down)
    x = up_block(params["up_block2"], x, out_encoder,
                 (TP("ub2.res0"), TP("ub2.res1"), TP("ub2.res2")), out_down)

    x = group_norm(x, params["out_norm_w"], params["out_norm_b"], eps=1e-5)
    x = silu(x)
    x = conv2d(x, params["out_conv"], stride=1, padding=1)
    return x.astype(jnp.float32).transpose(0, 3, 1, 2)              # NHWC -> NCHW


# ----------------------------------------------------------------------------
# Deterministic parameter init (PyTorch shapes) + one-time weight pre-packing
# ----------------------------------------------------------------------------
class ParamInit:
    def __init__(self, seed=0):
        self.key = jax.random.PRNGKey(seed)

    def _next(self):
        self.key, sub = jax.random.split(self.key)
        return sub

    def normal(self, shape, scale=0.02):
        return (scale * jax.random.normal(self._next(), shape)).astype(jnp.float32)

    def zeros(self, shape):
        return jnp.zeros(shape, jnp.float32)

    def ones(self, shape):
        return jnp.ones(shape, jnp.float32)


def _pack_matmul(wmat, bias, n, kh=1, kw=1):
    K, N = wmat.shape
    Kp, Np = _round_up(K, 128), _pad_n(N)
    wp = jnp.zeros((Kp, Np), jnp.bfloat16).at[:K, :N].set(wmat.astype(jnp.bfloat16))
    bp = jnp.zeros((1, Np), jnp.float32).at[0, :N].set(bias.astype(jnp.float32))
    return Packed(wp, bp, n, kh, kw)


class TimeCollector:
    """Collects every resnet's Linear(1280, dim_out) into one fused weight."""

    def __init__(self):
        self.ws, self.bs = [], []
        self.table = {}
        self.total = 0

    def add(self, name, w, b):          # w: (1280, dim), b: (dim,)
        d = w.shape[1]
        self.table[name] = (self.total, d)
        self.total += d
        self.ws.append(w)
        self.bs.append(b)

    def pack(self):
        W = jnp.concatenate(self.ws, axis=1)
        B = jnp.concatenate(self.bs)
        return _pack_matmul(W, B, self.total)


def init_linear(init, din, dout, bias=True):
    w = init.normal((dout, din))
    b = init.zeros((dout,))
    return _pack_matmul(w.T, b, dout)


def init_conv(init, cin, cout, k):
    w = init.normal((cout, cin, k, k))
    b = init.zeros((cout,))
    # rows ordered (di, dj, C) to match the NHWC im2col channel-concat.
    wmat = w.transpose(2, 3, 1, 0).reshape(k * k * cin, cout)
    return _pack_matmul(wmat, b, cout, kh=k, kw=k)


def init_resnet(init, dim_in, dim_out, tp, name):
    w_t = init.normal((dim_out, 1280))              # torch Linear(1280, dim_out)
    tp.add(name, w_t.T, init.zeros((dim_out,)))
    p = {
        "norm0_w": init.ones((dim_in,)), "norm0_b": init.zeros((dim_in,)),
        "conv0": init_conv(init, dim_in, dim_out, 3),
        "norm1_w": init.ones((dim_out,)), "norm1_b": init.zeros((dim_out,)),
        "conv1": init_conv(init, dim_out, dim_out, 3),
    }
    if dim_in != dim_out:
        p["res"] = init_conv(init, dim_in, dim_out, 1)
    return p


def init_cross_attention(init, dim_q, dim_kv):
    wq = init.normal((dim_q, dim_q))
    wk = init.normal((dim_q, dim_kv))
    wv = init.normal((dim_q, dim_kv))
    out = init_linear(init, dim_q, dim_q)
    if dim_kv == dim_q:         # self-attention: fuse Q,K,V into one matmul
        W = jnp.concatenate([wq.T, wk.T, wv.T], axis=1)      # (dim_q, 3*dim_q)
        return {"qkv": _pack_matmul(W, jnp.zeros((3 * dim_q,), jnp.float32), 3 * dim_q),
                "out": out}
    Wkv = jnp.concatenate([wk.T, wv.T], axis=1)              # (dim_kv, 2*dim_q)
    return {"q": _pack_matmul(wq.T, jnp.zeros((dim_q,), jnp.float32), dim_q),
            "kv": _pack_matmul(Wkv, jnp.zeros((2 * dim_q,), jnp.float32), 2 * dim_q),
            "out": out}


def init_transformer(init, dim):
    return {
        "norm_in_w": init.ones((dim,)), "norm_in_b": init.zeros((dim,)),
        "cnn_in": init_conv(init, dim, dim, 1),
        "ln0_w": init.ones((dim,)), "ln0_b": init.zeros((dim,)),
        "atten1": init_cross_attention(init, dim, dim),
        "ln1_w": init.ones((dim,)), "ln1_b": init.zeros((dim,)),
        "atten2": init_cross_attention(init, dim, 768),
        "ln_act_w": init.ones((dim,)), "ln_act_b": init.zeros((dim,)),
        "fc0": init_linear(init, dim, dim * 8),
        "fc1": init_linear(init, dim * 4, dim),
        "cnn_out": init_conv(init, dim, dim, 1),
    }


def init_down_block(init, dim_in, dim_out, tp, prefix):
    return {
        "res0": init_resnet(init, dim_in, dim_out, tp, prefix + ".res0"),
        "tf0": init_transformer(init, dim_out),
        "res1": init_resnet(init, dim_out, dim_out, tp, prefix + ".res1"),
        "tf1": init_transformer(init, dim_out),
        "out": init_conv(init, dim_out, dim_out, 3),
    }


def init_up_block(init, dim_in, dim_out, dim_prev, add_up, tp, prefix):
    p = {
        "res0": init_resnet(init, dim_out + dim_prev, dim_out, tp, prefix + ".res0"),
        "res1": init_resnet(init, dim_out + dim_out, dim_out, tp, prefix + ".res1"),
        "res2": init_resnet(init, dim_in + dim_out, dim_out, tp, prefix + ".res2"),
        "tf0": init_transformer(init, dim_out),
        "tf1": init_transformer(init, dim_out),
        "tf2": init_transformer(init, dim_out),
    }
    if add_up:
        p["out"] = init_conv(init, dim_out, dim_out, 3)
    return p


def init_unet(seed=0):
    init = ParamInit(seed)
    tp = TimeCollector()
    params = {
        "in_vae": init_conv(init, 4, 320, 3),
        "in_time0": init_linear(init, 320, 1280),
        "in_time1": init_linear(init, 1280, 1280),
        "down_block0": init_down_block(init, 320, 320, tp, "db0"),
        "down_block1": init_down_block(init, 320, 640, tp, "db1"),
        "down_block2": init_down_block(init, 640, 1280, tp, "db2"),
        "down_res0": init_resnet(init, 1280, 1280, tp, "down_res0"),
        "down_res1": init_resnet(init, 1280, 1280, tp, "down_res1"),
        "mid_res0": init_resnet(init, 1280, 1280, tp, "mid_res0"),
        "mid_tf": init_transformer(init, 1280),
        "mid_res1": init_resnet(init, 1280, 1280, tp, "mid_res1"),
        "up_res0": init_resnet(init, 2560, 1280, tp, "up_res0"),
        "up_res1": init_resnet(init, 2560, 1280, tp, "up_res1"),
        "up_res2": init_resnet(init, 2560, 1280, tp, "up_res2"),
        "up_in": init_conv(init, 1280, 1280, 3),
        "up_block0": init_up_block(init, 640, 1280, 1280, True, tp, "ub0"),
        "up_block1": init_up_block(init, 320, 640, 1280, True, tp, "ub1"),
        "up_block2": init_up_block(init, 320, 320, 640, False, tp, "ub2"),
        "out_norm_w": init.ones((320,)), "out_norm_b": init.zeros((320,)),
        "out_conv": init_conv(init, 320, 4, 3),
    }
    params["time_all"] = tp.pack()
    params["time_table"] = tp.table     # python ints, only used outside jit
    return params


# ----------------------------------------------------------------------------
if __name__ == "__main__":
    key = jax.random.PRNGKey(0)
    k1, k2 = jax.random.split(key)
    # small shapes: batch=1, latent 4x8x8, encoder seq=8, encoder dim=768
    out_vae = jax.random.normal(k1, (1, 4, 8, 8), dtype=jnp.float32)
    out_encoder = jax.random.normal(k2, (1, 8, 768), dtype=jnp.float32)
    time = jnp.float32(10.0)

    params = init_unet(seed=0)
    y = unet_forward(params, out_vae, out_encoder, time)
    y = jax.block_until_ready(y)
    assert y.shape == (1, 4, 8, 8), y.shape
    assert bool(jnp.all(jnp.isfinite(y)))
    print("KERNEL_OK")
</pallas_src>

<mosaic_0001>
module attributes {stable_mosaic.version = 11 : i64} {
  func.func @_mm_kernel(%arg0: i32, %arg1: i32, %arg2: i32, %arg3: memref<64x128xbf16, #tpu.memory_space<vmem>>, %arg4: memref<128x384xbf16, #tpu.memory_space<vmem>>, %arg5: memref<1x384xf32, #tpu.memory_space<vmem>>, %arg6: memref<64x384xbf16, #tpu.memory_space<vmem>>, %arg7: memref<64x384xf32, #tpu.memory_space<vmem>>) attributes {dimension_semantics = [#tpu.dimension_semantics<parallel>, #tpu.dimension_semantics<parallel>, #tpu.dimension_semantics<arbitrary>], iteration_bounds = array<i64: 1, 1, 1>, scalar_prefetch = 0 : i64, scratch_operands = 1 : i64, tpu.core_type = #tpu.core_type<tc>, window_params = [{transform_indices = @transform_0, window_bounds = array<i64: 64, 128>}, {transform_indices = @transform_1, window_bounds = array<i64: 128, 384>}, {transform_indices = @transform_2, window_bounds = array<i64: 1, 384>}, {transform_indices = @transform_3, window_bounds = array<i64: 64, 384>}]} {
    %c0_i32 = arith.constant 0 : i32
    %0 = arith.cmpi eq, %arg2, %c0_i32 : i32
    %1 = arith.extui %0 : i1 to i32
    %c0_i32_0 = arith.constant 0 : i32
    %2 = arith.cmpi ne, %1, %c0_i32_0 : i32
    scf.if %2 {
      %cst_10 = arith.constant 0.000000e+00 : f32
      %12 = vector.broadcast %cst_10 : f32 to vector<64x384xf32>
      %c0_11 = arith.constant 0 : index
      %c0_12 = arith.constant 0 : index
      %13 = vector.load %arg7[%c0_11, %c0_12] : memref<64x384xf32, #tpu.memory_space<vmem>>, vector<64x384xf32>
      tpu.vector_store %arg7[%c0_11, %c0_12], %12 {strides = array<i32>} : memref<64x384xf32, #tpu.memory_space<vmem>>, vector<64x384xf32>,
    } else {
    }
    %c0 = arith.constant 0 : index
    %c0_1 = arith.constant 0 : index
    %3 = vector.load %arg7[%c0, %c0_1] : memref<64x384xf32, #tpu.memory_space<vmem>>, vector<64x384xf32>
    %c0_2 = arith.constant 0 : index
    %c0_3 = arith.constant 0 : index
    %4 = vector.load %arg3[%c0_2, %c0_3] : memref<64x128xbf16, #tpu.memory_space<vmem>>, vector<64x128xbf16>
    %c0_4 = arith.constant 0 : index
    %c0_5 = arith.constant 0 : index
    %5 = vector.load %arg4[%c0_4, %c0_5] : memref<128x384xbf16, #tpu.memory_space<vmem>>, vector<128x384xbf16>
    %cst = arith.constant dense<0.000000e+00> : vector<64x384xf32>
    %6 = tpu.matmul %4, %5, %cst {dimension_numbers = #tpu.dot_dimension_numbers<[1], [0], [0], [1], [0, 0, 1, 1], [], []>} : vector<64x128xbf16>, vector<128x384xbf16>, vector<64x384xf32> -> vector<64x384xf32>
    %7 = arith.addf %3, %6 : vector<64x384xf32>
    %c0_6 = arith.constant 0 : index
    %c0_7 = arith.constant 0 : index
    %8 = vector.load %arg7[%c0_6, %c0_7] : memref<64x384xf32, #tpu.memory_space<vmem>>, vector<64x384xf32>
    tpu.vector_store %arg7[%c0_6, %c0_7], %7 {strides = array<i32>} : memref<64x384xf32, #tpu.memory_space<vmem>>, vector<64x384xf32>,
    %c0_i32_8 = arith.constant 0 : i32
    %9 = arith.cmpi eq, %arg2, %c0_i32_8 : i32
    %10 = arith.extui %9 : i1 to i32
    %c0_i32_9 = arith.constant 0 : i32
    %11 = arith.cmpi ne, %10, %c0_i32_9 : i32
    scf.if %11 {
      %c0_10 = arith.constant 0 : index
      %c0_11 = arith.constant 0 : index
      %12 = vector.load %arg7[%c0_10, %c0_11] : memref<64x384xf32, #tpu.memory_space<vmem>>, vector<64x384xf32>
      %c0_12 = arith.constant 0 : index
      %c0_13 = arith.constant 0 : index
      %13 = vector.load %arg5[%c0_12, %c0_13] : memref<1x384xf32, #tpu.memory_space<vmem>>, vector<1x384xf32>
      %14 = vector.broadcast %13 : vector<1x384xf32> to vector<64x384xf32>
      %15 = arith.addf %12, %14 : vector<64x384xf32>
      %16 = arith.truncf %15 : vector<64x384xf32> to vector<64x384xbf16>
      %c0_14 = arith.constant 0 : index
      %c0_15 = arith.constant 0 : index
      %17 = vector.load %arg6[%c0_14, %c0_15] : memref<64x384xbf16, #tpu.memory_space<vmem>>, vector<64x384xbf16>
      tpu.vector_store %arg6[%c0_14, %c0_15], %16 {strides = array<i32>} : memref<64x384xbf16, #tpu.memory_space<vmem>>, vector<64x384xbf16>,
    } else {
    }
    return
  }
  func.func @transform_0(%arg0: i32, %arg1: i32, %arg2: i32) -> (i32, i32) {
    %c0_i32 = arith.constant 0 : i32
    return %arg0, %arg2 : i32, i32
  }
  func.func @transform_1(%arg0: i32, %arg1: i32, %arg2: i32) -> (i32, i32) {
    %c0_i32 = arith.constant 0 : i32
    return %arg2, %arg1 : i32, i32
  }
  func.func @transform_2(%arg0: i32, %arg1: i32, %arg2: i32) -> (i32, i32) {
    %c0_i32 = arith.constant 0 : i32
    %c0_i32_0 = arith.constant 0 : i32
    return %c0_i32, %arg1 : i32, i32
  }
  func.func @transform_3(%arg0: i32, %arg1: i32, %arg2: i32) -> (i32, i32) {
    %c0_i32 = arith.constant 0 : i32
    return %arg0, %arg1 : i32, i32
  }
}

</mosaic_0001>

<bundles_post_ra>
// kernel: _conv2d.1
= control target key start
LH: loop header
LB: loop body
LE: loop exit
PB: predicated region body
PF: predicated region fallthrough
CT: control target
= control target key end

     0   :  { %v746_v1 = vmov 0   ;;  %v474_v29 = vlaneseq  ;;  %s926_s1 = inlined_call_operand.vmem [shape: bf16[128,384], index: 1, kind: input, shape index: {}]   ;;  %s927_s0 = inlined_call_operand.vmem [shape: bf16[64,128], index: 0, kind: input, shape index: {}]   ;;  %s928_s2 = inlined_call_operand.vmem [shape: f32[1,384], index: 2, kind: input, shape index: {}]   ;;  %s929_s3 = inlined_call_operand.vmem [shape: bf16[64,384], index: 3, kind: output, shape index: {}]  }
   0x1   :  { %v710_v0 = vld [vmem:[%s926_s1 + $0xac] ss:$12 sps:$4 sm:$0xff]   ;;  %291 = vmatprep.mubr.bf16.mxu0 %v746_v1  ;;  %v712_v2 = vld [vmem:[%s926_s1 + $0xa8] ss:$12 sps:$4 sm:$0xff]   ;;  %v715_v4 = vld [vmem:[%s926_s1 + $0x90] ss:$12 sps:$4 sm:$0xff]  }
   0x2   :  { %259 = vmatprep.subr.bf16.mxu0 %v710_v0  ;;  %v713_v3 = vld [vmem:[%s926_s1 + $0x94] ss:$12 sps:$4 sm:$0xff]   ;;  %v716_v5 = vld [vmem:[%s926_s1 + $0x7c] ss:$12 sps:$4 sm:$0xff]   ;;  %v718_v7 = vld [vmem:[%s926_s1 + $0x78] ss:$12 sps:$4 sm:$0xff]  }
   0x3   :  { %260 = vmatpush1.bf16.msra.mxu0 %v712_v2  ;;  %v719_v6 = vld [vmem:[%s926_s1 + $0xb0] ss:$12 sps:$4 sm:$0xff]   ;;  %v723_v8 = vld [vmem:[%s926_s1 + $0x98] ss:$12 sps:$4 sm:$0xff]   ;;  %v727_v10 = vld [vmem:[%s926_s1 + $0x80] ss:$12 sps:$4 sm:$0xff]  }
   0x4   :  { %261 = vmatprep.subr.bf16.mxu0 %v713_v3  ;;  %685 = vmatprep.subr.bf16.mxu1 %v719_v6  ;;  %v720_v9 = vld [vmem:[%s926_s1 + $0x64] ss:$12 sps:$4 sm:$0xff]   ;;  %v722_v11 = vld [vmem:[%s926_s1 + $0x60] ss:$12 sps:$4 sm:$0xff]   ;;  %v731_v13 = vld [vmem:[%s926_s1 + $0x68] ss:$12 sps:$4 sm:$0xff]  }
   0x5   :  { %686 = vmatpush3.bf16.msra.mxu1 %v719_v6  ;;  %v724_v12 = vld [vmem:[%s926_s1 + $0x4c] ss:$12 sps:$4 sm:$0xff]   ;;  %v726_v14 = vld [vmem:[%s926_s1 + $0x48] ss:$12 sps:$4 sm:$0xff]   ;;  %v735_v16 = vld [vmem:[%s926_s1 + $0x50] ss:$12 sps:$4 sm:$0xff]  }
   0x6   :  { %687 = vmatprep.subr.bf16.mxu1 %v723_v8  ;;  %v728_v15 = vld [vmem:[%s926_s1 + $0x34] ss:$12 sps:$4 sm:$0xff]   ;;  %v730_v17 = vld [vmem:[%s926_s1 + $0x30] ss:$12 sps:$4 sm:$0xff]   ;;  %v739_v20 = vld [vmem:[%s926_s1 + $0x38] ss:$12 sps:$4 sm:$0xff]  }
   0x7   :  { %262 = vmatpush1.bf16.msra.mxu0 %v715_v4  ;;  %v732_v18 = vld [vmem:[%s926_s1 + $0x1c] ss:$12 sps:$4 sm:$0xff]   ;;  %v740_v19 = vld [vmem:[%s927_s0] sm:$0xff]   ;;  %v744_v26 = vld [vmem:[%s927_s0 + $0x10] sm:$0xff]   ;;  %v475_v30 = vshrl.u32 %v474_v29, 7 }
   0x8   :  { %263 = vmatprep.subr.bf16.mxu0 %v716_v5  ;;  %701 = vmatprep.mubr.bf16.mxu1 %v740_v19  ;;  %v734_v21 = vld [vmem:[%s926_s1 + $0x18] ss:$12 sps:$4 sm:$0xff]   ;;  %v741_v23 = vld [vmem:[%s926_s1 + $0x20] ss:$12 sps:$4 sm:$0xff]   ;;  %v742_v25 = vld [vmem:[%s926_s1 + $0x8] ss:$12 sps:$4 sm:$0xff]  }
   0x9   :  { %688 = vmatpush3.bf16.msra.mxu1 %v723_v8  ;;  %v736_v22 = vld [vmem:[%s926_s1 + $0x4] ss:$12 sps:$4 sm:$0xff]   ;;  %v738_v24 = vld [vmem:[%s926_s1] ss:$12 sps:$4 sm:$0xff]   ;;  %v745_v28 = vld [vmem:[%s927_s0 + $0x18] sm:$0xff]   ;;  %v476_v31 = vsub.s32 0, %v475_v30 }
   0xa   :  { %689 = vmatprep.subr.bf16.mxu1 %v727_v10  ;;  %v743_v27 = vld [vmem:[%s927_s0 + $0x8] sm:$0xff]   ;;  %v480_v32 = vsub.s32 1, %v475_v30  ;;  %v472_v33 = vld [vmem:[%s928_s2] sm:$0x7]  ;;  %v484_v34 = vsub.s32 2, %v475_v30 }
   0xb   :  { %264 = vmatpush1.bf16.msra.mxu0 %v718_v7  ;;  %v858_v35 = vrot.slane %v472_v33, %v476_v31 }
   0xc   :  { %265 = vmatprep.subr.bf16.mxu0 %v720_v9  ;;  %v860_v36 = vrot.slane %v472_v33, %v480_v32  ;;  %v485_v38 = vrot.slane %v472_v33, %v484_v34 }
   0xd   :  { %690 = vmatpush3.bf16.msra.mxu1 %v727_v10 }
   0xe   :  { %691 = vmatprep.subr.bf16.mxu1 %v731_v13 }
   0xf   :  { %266 = vmatpush1.bf16.msra.mxu0 %v722_v11 }
  0x10   :  { %267 = vmatprep.subr.bf16.mxu0 %v724_v12 }
  0x11   :  { %692 = vmatpush3.bf16.msra.mxu1 %v731_v13 }
  0x12   :  { %693 = vmatprep.subr.bf16.mxu1 %v735_v16 }
  0x13   :  { %268 = vmatpush1.bf16.msra.mxu0 %v726_v14 }
  0x14   :  { %269 = vmatprep.subr.bf16.mxu0 %v728_v15 }
  0x15   :  { %694 = vmatpush3.bf16.msra.mxu1 %v735_v16 }
  0x16   :  { %695 = vmatprep.subr.bf16.mxu1 %v739_v20 }
  0x17   :  { %270 = vmatpush1.bf16.msra.mxu0 %v730_v17 }
  0x18   :  { %271 = vmatprep.subr.bf16.mxu0 %v732_v18 }
  0x19   :  { %696 = vmatpush3.bf16.msra.mxu1 %v739_v20 }
  0x1a   :  { %697 = vmatprep.subr.bf16.mxu1 %v741_v23 }
  0x1b   :  { %272 = vmatpush1.bf16.msra.mxu0 %v734_v21 }
  0x1c   :  { %273 = vmatprep.subr.bf16.mxu0 %v736_v22 }
  0x1d   :  { %698 = vmatpush3.bf16.msra.mxu1 %v741_v23 }
  0x1e   :  { %699 = vmatprep.subr.bf16.mxu1 %v742_v25 }
  0x1f   :  { %274 = vmatpush1.bf16.msra.mxu0 %v738_v24 }
  0x21   :  { %700 = vmatpush3.bf16.msra.mxu1 %v742_v25 }
  0x22   :  { %292 = vmatmul.mubr.bf16.vlgmr.msra.gmra.mxu0 %v740_v19 }
  0x23   :  { %301 = vmatprep.mubr.bf16.mxu0 %v746_v1 }
  0x24   :  { %702 = vmatmul.mubr.bf16.vlgmr.msra.gmra.mxu1 %v743_v27 }
  0x25   :  { %705 = vmatprep.mubr.bf16.mxu1 %v744_v26 }
  0x2a   :  { %302 = vmatmul.mubr.bf16.gmra.mxu0 %v743_v27 }
  0x2b   :  { %311 = vmatprep.mubr.bf16.mxu0 %v746_v1 }
  0x2c   :  { %706 = vmatmul.mubr.bf16.gmra.mxu1 %v745_v28 }
  0x32   :  { %312 = vmatmul.mubr.bf16.gmra.mxu0 %v744_v26 }
  0x33   :  { %321 = vmatprep.mubr.bf16.mxu0 %v746_v1 }
  0x3a   :  { %322 = vmatmul.mubr.bf16.gmra.mxu0 %v745_v28 }
  0xe2   :  { %v293_v37 = vpop.f32.mrf.mxu0 }
  0xe3   :  { %v489_v40 = vadd.f32 %v858_v35, %v293_v37 }
  0xe4   :  { %v295_v39 = vpop.f32.mrf.mxu0  ;;  %v703_v43 = vpop.f32.mrf.mxu1 }
  0xe5   :  { %v490_v41 = vadd.f32 %v860_v36, %v295_v39  ;;  %v497_v45 = vadd.f32 %v703_v43, %v485_v38 }
  0xe6   :  { %v297_v42 = vpop.f32.mrf.mxu0  ;;  %v366_v47 = vpop.f32.mrf.mxu1 }
  0xe7   :  { %v657_v44 = vpack.c.bf16 %v490_v41, %v489_v40  ;;  %v492_v48 = vadd.f32 %v858_v35, %v297_v42  ;;  %v662_v50 = vpack.c.bf16 %v497_v45, %v497_v45  ;;  %v491_v51 = vadd.f32 %v485_v38, %v366_v47 }
  0xe8   :  { %v299_v46 = vpop.f32.mrf.mxu0  ;;  %v704_v53 = vpop.f32.mrf.mxu1 }
  0xe9   :  { %593 = vst [vmem:[%s929_s3] sm:$0xff] %v657_v44  ;;  %v493_v49 = vadd.f32 %v860_v36, %v299_v46  ;;  %598 = vst [vmem:[%s929_s3 + $0x20] sm:$0xf] %v662_v50  ;;  %v658_v55 = vpack.c.bf16 %v491_v51, %v491_v51  ;;  %v500_v56 = vadd.f32 %v704_v53, %v485_v38 }
  0xea   :  { %v303_v52 = vpop.f32.mrf.mxu0  ;;  %v369_v58 = vpop.f32.mrf.mxu1 }
  0xeb   :  { %v659_v54 = vpack.c.bf16 %v493_v49, %v492_v48  ;;  %v495_v59 = vadd.f32 %v858_v35, %v303_v52  ;;  %594 = vst [vmem:[%s929_s3 + $0x8] sm:$0xf] %v658_v55  ;;  %v664_v61 = vpack.c.bf16 %v500_v56, %v500_v56  ;;  %v494_v62 = vadd.f32 %v485_v38, %v369_v58 }
  0xec   :  { %v305_v57 = vpop.f32.mrf.mxu0  ;;  %v707_v0 = vpop.f32.mrf.mxu1 }
  0xed   :  { %595 = vst [vmem:[%s929_s3 + $0xc] sm:$0xff] %v659_v54  ;;  %v496_v60 = vadd.f32 %v860_v36, %v305_v57  ;;  %600 = vst [vmem:[%s929_s3 + $0x2c] sm:$0xf] %v664_v61  ;;  %v660_v2 = vpack.c.bf16 %v494_v62, %v494_v62  ;;  %v509_v3 = vadd.f32 %v707_v0, %v485_v38 }
  0xee   :  { %v307_v63 = vpop.f32.mrf.mxu0  ;;  %v382_v5 = vpop.f32.mrf.mxu1 }
  0xef   :  { %v661_v1 = vpack.c.bf16 %v496_v60, %v495_v59  ;;  %v498_v6 = vadd.f32 %v858_v35, %v307_v63  ;;  %596 = vst [vmem:[%s929_s3 + $0x14] sm:$0xf] %v660_v2  ;;  %v670_v8 = vpack.c.bf16 %v509_v3, %v509_v3  ;;  %v503_v9 = vadd.f32 %v485_v38, %v382_v5 }
  0xf0   :  { %v309_v4 = vpop.f32.mrf.mxu0  ;;  %v708_v11 = vpop.f32.mrf.mxu1 }
  0xf1   :  { %597 = vst [vmem:[%s929_s3 + $0x18] sm:$0xff] %v661_v1  ;;  %v499_v7 = vadd.f32 %v860_v36, %v309_v4  ;;  %606 = vst [vmem:[%s929_s3 + $0x50] sm:$0xf] %v670_v8  ;;  %v666_v13 = vpack.c.bf16 %v503_v9, %v503_v9  ;;  %v512_v14 = vadd.f32 %v708_v11, %v485_v38 }
  0xf2   :  { %v313_v10 = vpop.f32.mrf.mxu0  ;;  %v385_v16 = vpop.f32.mrf.mxu1 }
  0xf3   :  { %v663_v12 = vpack.c.bf16 %v499_v7, %v498_v6  ;;  %v501_v17 = vadd.f32 %v858_v35, %v313_v10  ;;  %602 = vst [vmem:[%s929_s3 + $0x38] sm:$0xf] %v666_v13  ;;  %v672_v19 = vpack.c.bf16 %v512_v14, %v512_v14  ;;  %v506_v20 = vadd.f32 %v485_v38, %v385_v16 }
  0xf4   :  { %v315_v15 = vpop.f32.mrf.mxu0 }
  0xf5   :  { %599 = vst [vmem:[%s929_s3 + $0x24] sm:$0xff] %v663_v12  ;;  %v502_v18 = vadd.f32 %v860_v36, %v315_v15  ;;  %608 = vst [vmem:[%s929_s3 + $0x5c] sm:$0xf] %v672_v19  ;;  %v668_v23 = vpack.c.bf16 %v506_v20, %v506_v20 }
  0xf6   :  { %v317_v21 = vpop.f32.mrf.mxu0 }
  0xf7   :  { %v665_v22 = vpack.c.bf16 %v502_v18, %v501_v17  ;;  %v504_v25 = vadd.f32 %v858_v35, %v317_v21  ;;  %604 = vst [vmem:[%s929_s3 + $0x44] sm:$0xf] %v668_v23 }
  0xf8   :  { %v319_v24 = vpop.f32.mrf.mxu0 }
  0xf9   :  { %601 = vst [vmem:[%s929_s3 + $0x30] sm:$0xff] %v665_v22  ;;  %v505_v26 = vadd.f32 %v860_v36, %v319_v24 }
  0xfa   :  { %v323_v27 = vpop.f32.mrf.mxu0 }
  0xfb   :  { %v667_v28 = vpack.c.bf16 %v505_v26, %v504_v25  ;;  %v507_v30 = vadd.f32 %v858_v35, %v323_v27 }
  0xfc   :  { %v325_v29 = vpop.f32.mrf.mxu0 }
  0xfd   :  { %603 = vst [vmem:[%s929_s3 + $0x3c] sm:$0xff] %v667_v28  ;;  %v508_v31 = vadd.f32 %v860_v36, %v325_v29 }
  0xfe   :  { %v327_v32 = vpop.f32.mrf.mxu0 }
  0xff   :  { %v669_v33 = vpack.c.bf16 %v508_v31, %v507_v30  ;;  %v510_v37 = vadd.f32 %v858_v35, %v327_v32 }
 0x100   :  { %v329_v34 = vpop.f32.mrf.mxu0 }
 0x101   :  { %605 = vst [vmem:[%s929_s3 + $0x48] sm:$0xff] %v669_v33  ;;  %v511_v38 = vadd.f32 %v860_v36, %v329_v34 }
 0x103   :  { %v671_v39 = vpack.c.bf16 %v511_v38, %v510_v37 }
 0x105   :  { %607 = vst [vmem:[%s929_s3 + $0x54] sm:$0xff] %v671_v39 }

</bundles_post_ra>
